<compile_context>
chip_gen: v5e
topology: v5e:2x2
jax: 0.10.0
libtpu: 0.0.40
codegen_flags: <defaults>
</compile_context>

<pallas_src>
import math

import jax
import jax.numpy as jnp
from jax import lax
from jax.experimental import pallas as pl
from jax.experimental.pallas import tpu as pltpu


# ----------------------------- helpers --------------------------------------


def _round_up(x, m):
    return (x + m - 1) // m * m


def _pick_tile(n_rows, row_tile):
    t = min(int(row_tile), _round_up(n_rows, 8))
    return max(8, _round_up(t, 8))


def _vmem_limit(tq, same_rows, other_rows, c):
    feat = (tq + same_rows + other_rows) * c          # feature tiles (f32 + bf16 copies)
    quad = tq * (same_rows + other_rows)              # similarity / exp / log temporaries
    est = 4 * (4 * feat + 6 * quad + 8 * tq + 2 * (other_rows + 1))
    # clamp: >= default scoped VMEM, <= v7x physical VMEM (smallest of the three gens)
    return int(min(64 * 2 ** 20, max(32 * 2 ** 20, 2 * est)))


_EPS2 = 1e-24      # (F.normalize eps)^2
_DN = (((1,), (1,)), ((), ()))   # contract channel (last) dim of both operands: A @ B^T


def _normalize_f32(v):
    # F.normalize(dim=1): v / max(||v||, eps)  ==  v * rsqrt(max(sum(v*v), eps^2))
    return v * lax.rsqrt(jnp.maximum(jnp.sum(v * v, axis=1, keepdims=True), _EPS2))


# ----------------------------- kernels --------------------------------------


def _make_pos_kernel(tq, mp, n_other, c, m_valid, temperature):
    """Pos-anchored half.

    Per query (pos) row r:  sum_{j != r} [ log(exp(s11[r,j]) + ns1[r]) - s11[r,j] ]
    with ns1[r] = sum_k exp(s12[r,k]).  Also accumulates the column sums of
    exp(s12) across row tiles (== ns2 for the neg-anchored half).
    """
    inv_t = 1.0 / float(temperature)
    exp_inv_t = math.exp(inv_t)       # exp of the (exact) diagonal similarity
    need_mask = mp != m_valid

    def kernel(q_ref, xk_ref, yk_ref, loss_ref, ns2_ref):
        i = pl.program_id(0)

        @pl.when(i == 0)
        def _():
            ns2_ref[...] = jnp.zeros_like(ns2_ref)

        # Load + normalize in f32 (accepts bf16 inputs end-to-end).
        qn = _normalize_f32(q_ref[...].astype(jnp.float32))    # [tq, C]
        xn = _normalize_f32(xk_ref[...].astype(jnp.float32))   # [mp, C]
        yn = _normalize_f32(yk_ref[...].astype(jnp.float32))   # [n,  C]

        # bf16 operands on the MXU, f32 accumulation.
        qb = qn.astype(jnp.bfloat16)
        xb = xn.astype(jnp.bfloat16)
        yb = yn.astype(jnp.bfloat16)

        s12 = lax.dot_general(qb, yb, _DN, preferred_element_type=jnp.float32) * inv_t  # [tq, n]
        e12 = jnp.exp(s12)
        # NOTE: like the PyTorch reference, exp(s/t) can overflow f32 for very small t.

        if need_mask:
            rows = i * tq + lax.broadcasted_iota(jnp.int32, (tq, 1), 0)
            row_valid = rows < m_valid
            e12_cols = jnp.where(row_valid, e12, 0.0)
        else:
            e12_cols = e12

        # Accumulate column sums of exp(s12)  ->  ns2 for the neg-anchored kernel.
        ns2_ref[...] += jnp.sum(e12_cols, axis=0, keepdims=True)                        # [1, n]

        ns1 = jnp.sum(e12, axis=1, keepdims=True)                                       # [tq, 1]

        s11 = lax.dot_general(qb, xb, _DN, preferred_element_type=jnp.float32) * inv_t  # [tq, mp]
        # -log(exp(s)/(exp(s)+ns)) == log(exp(s)+ns) - s   (divide-free form)
        l = jnp.log(jnp.exp(s11) + ns1) - s11
        if need_mask:
            cols = lax.broadcasted_iota(jnp.int32, (tq, mp), 1)
            l = jnp.where(cols < m_valid, l, 0.0)
        row_sum = jnp.sum(l, axis=1, keepdims=True)                                     # [tq, 1]

        # Remove the diagonal analytically: diag(s11) == 1/t for normalized rows.
        diag = jnp.log(exp_inv_t + ns1) - inv_t                                         # [tq, 1]
        res = row_sum - diag
        if need_mask:
            res = jnp.where(row_valid, res, 0.0)
        loss_ref[...] = res

    return kernel


def _make_neg_kernel(tq, np_rows, c, n_valid, temperature):
    """Neg-anchored half; ns2 (sum over pos keys of exp(sim)) is precomputed."""
    inv_t = 1.0 / float(temperature)
    exp_inv_t = math.exp(inv_t)
    need_mask = np_rows != n_valid

    def kernel(q_ref, xk_ref, ns_ref, out_ref):
        qn = _normalize_f32(q_ref[...].astype(jnp.float32))     # [tq, C]
        xn = _normalize_f32(xk_ref[...].astype(jnp.float32))    # [np, C]
        ns = ns_ref[...]                                        # [tq, 1]  precomputed

        qb = qn.astype(jnp.bfloat16)
        xb = xn.astype(jnp.bfloat16)

        s22 = lax.dot_general(qb, xb, _DN, preferred_element_type=jnp.float32) * inv_t  # [tq, np]
        l = jnp.log(jnp.exp(s22) + ns) - s22
        if need_mask:
            cols = lax.broadcasted_iota(jnp.int32, (tq, np_rows), 1)
            l = jnp.where(cols < n_valid, l, 0.0)
        row_sum = jnp.sum(l, axis=1, keepdims=True)

        diag = jnp.log(exp_inv_t + ns) - inv_t
        res = row_sum - diag
        if need_mask:
            rows = pl.program_id(0) * tq + lax.broadcasted_iota(jnp.int32, (tq, 1), 0)
            res = jnp.where(rows < n_valid, res, 0.0)
        out_ref[...] = res

    return kernel


# ----------------------------- wrapper ---------------------------------------


def sup_dcl_loss(pos_feats, neg_feats, *, temperature=0.1, base_temperature=0.07,
                 loss_weight=1.0, row_tile=128):
    """Pallas implementation of SupDCLLoss.forward (single-device all_gather).

    base_temperature is accepted only for parity with the reference module; its
    forward() never uses it.
    """
    del base_temperature  # unused by the reference forward (parity)

    m, c = pos_feats.shape
    n, cn = neg_feats.shape
    if c != cn:
        raise ValueError("pos_feats / neg_feats channel mismatch")
    if m < 2 or n < 2:
        raise ValueError("SupDCLLoss needs at least 2 rows in each feature set")

    pos = jnp.asarray(pos_feats)
    neg = jnp.asarray(neg_feats)

    # ---- call A: pos-anchored half + column sums of exp(pos @ neg.T / t) ----
    tq1 = _pick_tile(m, row_tile)
    mp = _round_up(m, tq1)
    posp = pos if mp == m else jnp.zeros((mp, c), pos.dtype).at[:m].set(pos)

    kernel_a = _make_pos_kernel(tq1, mp, n, c, m, temperature)
    loss1_rows, ns2_row = pl.pallas_call(
        kernel_a,
        out_shape=(jax.ShapeDtypeStruct((mp, 1), jnp.float32),
                   jax.ShapeDtypeStruct((1, n), jnp.float32)),
        grid_spec=pltpu.PrefetchScalarGridSpec(
            num_scalar_prefetch=0,
            grid=(mp // tq1,),
            in_specs=[
                pl.BlockSpec((tq1, c), lambda i: (i, 0)),   # pos query row tile
                pl.BlockSpec((mp, c), lambda i: (0, 0)),    # pos keys (resident)
                pl.BlockSpec((n, c), lambda i: (0, 0)),     # neg keys (resident)
            ],
            out_specs=(
                pl.BlockSpec((tq1, 1), lambda i: (i, 0)),   # per-row loss1 sums
                pl.BlockSpec((1, n), lambda i: (0, 0)),     # ns2 accumulator
            ),
        ),
        compiler_params=pltpu.CompilerParams(
            dimension_semantics=("arbitrary",),             # ns2 is accumulated across tiles
            vmem_limit_bytes=_vmem_limit(tq1, mp, n, c),
        ),
    )(posp, posp, neg)

    # ---- call B: neg-anchored half, reuses ns2 (no neg @ pos.T matmul/exp) ----
    tq2 = _pick_tile(n, row_tile)
    np_rows = _round_up(n, tq2)
    negp = neg if np_rows == n else jnp.zeros((np_rows, c), neg.dtype).at[:n].set(neg)
    ns2_col = ns2_row.reshape(n, 1)
    if np_rows != n:
        ns2_col = jnp.zeros((np_rows, 1), jnp.float32).at[:n].set(ns2_col)

    kernel_b = _make_neg_kernel(tq2, np_rows, c, n, temperature)
    loss2_rows = pl.pallas_call(
        kernel_b,
        out_shape=jax.ShapeDtypeStruct((np_rows, 1), jnp.float32),
        grid_spec=pltpu.PrefetchScalarGridSpec(
            num_scalar_prefetch=0,
            grid=(np_rows // tq2,),
            in_specs=[
                pl.BlockSpec((tq2, c), lambda i: (i, 0)),       # neg query row tile
                pl.BlockSpec((np_rows, c), lambda i: (0, 0)),   # neg keys (resident)
                pl.BlockSpec((tq2, 1), lambda i: (i, 0)),       # precomputed ns2 rows
            ],
            out_specs=pl.BlockSpec((tq2, 1), lambda i: (i, 0)),
        ),
        compiler_params=pltpu.CompilerParams(
            dimension_semantics=("parallel",),                  # shards across TCs on v7x
            vmem_limit_bytes=_vmem_limit(tq2, np_rows, 0, c),
        ),
    )(negp, negp, ns2_col)

    loss1 = jnp.sum(loss1_rows) / (m * (m - 1))
    loss2 = jnp.sum(loss2_rows) / (n * (n - 1))
    # TODO(synk): the reference's host-side warning print when loss1/loss2 < 0 is omitted.
    return 0.5 * (loss1 + loss2) * loss_weight


# ----------------------------- reference & test -------------------------------


def _reference_loss(pos, neg, temperature=0.1, loss_weight=1.0):
    """Plain-JAX f32 reference mirroring the PyTorch forward (for sanity check)."""
    eps = 1e-12
    pos = pos / jnp.maximum(jnp.linalg.norm(pos, axis=1, keepdims=True), eps)
    neg = neg / jnp.maximum(jnp.linalg.norm(neg, axis=1, keepdims=True), eps)
    m, n = pos.shape[0], neg.shape[0]
    e11 = jnp.exp(pos @ pos.T / temperature)
    e22 = jnp.exp(neg @ neg.T / temperature)
    e12 = jnp.exp(pos @ neg.T / temperature)
    l1 = -jnp.log(e11 / (e11 + jnp.sum(e12, axis=1, keepdims=True)))
    l2 = -jnp.log(e22 / (e22 + jnp.sum(e12.T, axis=1, keepdims=True)))
    m1 = ~jnp.eye(m, dtype=bool)
    m2 = ~jnp.eye(n, dtype=bool)
    loss1 = jnp.sum(jnp.where(m1, l1, 0.0)) / (m * (m - 1))
    loss2 = jnp.sum(jnp.where(m2, l2, 0.0)) / (n * (n - 1))
    return 0.5 * (loss1 + loss2) * loss_weight


if __name__ == "__main__":
    key = jax.random.PRNGKey(0)
    k1, k2 = jax.random.split(key)
    M, N, C = 40, 24, 32
    pos_feats = jax.random.normal(k1, (M, C), dtype=jnp.float32)
    neg_feats = jax.random.normal(k2, (N, C), dtype=jnp.float32)

    ref = jax.block_until_ready(
        _reference_loss(pos_feats, neg_feats, temperature=0.1, loss_weight=1.0))

    # (a) single-tile path (row_tile >= M, N)
    loss_a = jax.block_until_ready(
        sup_dcl_loss(pos_feats, neg_feats, temperature=0.1,
                     base_temperature=0.07, loss_weight=1.0))
    # (b) multi-tile path: exercises the grid, row padding and edge masks
    loss_b = jax.block_until_ready(
        sup_dcl_loss(pos_feats, neg_feats, temperature=0.1,
                     base_temperature=0.07, loss_weight=1.0, row_tile=16))

    for val in (loss_a, loss_b):
        v = float(val)
        assert jnp.isfinite(val), "loss is not finite"
        assert abs(v - float(ref)) <= 2e-2 * max(1.0, abs(float(ref))), (
            f"mismatch: kernel={v} ref={float(ref)}")

    print("KERNEL_OK")
</pallas_src>

<mosaic_0001>
module attributes {stable_mosaic.version = 11 : i64} {
  func.func @kernel(%arg0: i32, %arg1: memref<40x32xf32, #tpu.memory_space<vmem>>, %arg2: memref<40x32xf32, #tpu.memory_space<vmem>>, %arg3: memref<24x32xf32, #tpu.memory_space<vmem>>, %arg4: memref<40x1xf32, #tpu.memory_space<vmem>>, %arg5: memref<1x24xf32, #tpu.memory_space<vmem>>) attributes {dimension_semantics = [#tpu.dimension_semantics<arbitrary>], iteration_bounds = array<i64: 1>, scalar_prefetch = 0 : i64, scratch_operands = 0 : i64, tpu.core_type = #tpu.core_type<tc>, window_params = [{transform_indices = @transform_0, window_bounds = array<i64: 40, 32>}, {pipeline_mode = #tpu.pipeline_mode<synchronous>, transform_indices = @transform_1, window_bounds = array<i64: 40, 32>}, {pipeline_mode = #tpu.pipeline_mode<synchronous>, transform_indices = @transform_2, window_bounds = array<i64: 24, 32>}, {transform_indices = @transform_3, window_bounds = array<i64: 40, 1>}, {pipeline_mode = #tpu.pipeline_mode<synchronous>, transform_indices = @transform_4, window_bounds = array<i64: 1, 24>}]} {
    %c0_i32 = arith.constant 0 : i32
    %0 = arith.cmpi eq, %arg0, %c0_i32 : i32
    %1 = arith.extui %0 : i1 to i32
    %c0_i32_0 = arith.constant 0 : i32
    %2 = arith.cmpi ne, %1, %c0_i32_0 : i32
    scf.if %2 {
      %cst_26 = arith.constant 0.000000e+00 : f32
      %61 = vector.broadcast %cst_26 : f32 to vector<1x24xf32>
      %c0_27 = arith.constant 0 : index
      %c0_28 = arith.constant 0 : index
      %62 = vector.load %arg5[%c0_27, %c0_28] : memref<1x24xf32, #tpu.memory_space<vmem>>, vector<1x24xf32>
      tpu.vector_store %arg5[%c0_27, %c0_28], %61 {strides = array<i32>} : memref<1x24xf32, #tpu.memory_space<vmem>>, vector<1x24xf32>,
    } else {
    }
    %c0 = arith.constant 0 : index
    %c0_1 = arith.constant 0 : index
    %3 = vector.load %arg1[%c0, %c0_1] : memref<40x32xf32, #tpu.memory_space<vmem>>, vector<40x32xf32>
    %4 = arith.mulf %3, %3 : vector<40x32xf32>
    %cst = arith.constant dense<0.000000e+00> : vector<40xf32>
    %5 = vector.multi_reduction <add>, %4, %cst [1] : vector<40x32xf32> to vector<40xf32>
    %6 = vector.shape_cast %5 : vector<40xf32> to vector<40x1xf32>
    %cst_2 = arith.constant 1.000000e-24 : f32
    %7 = vector.broadcast %cst_2 : f32 to vector<40x1xf32>
    %8 = arith.maximumf %6, %7 : vector<40x1xf32>
    %9 = math.rsqrt %8 : vector<40x1xf32>
    %10 = vector.broadcast %9 : vector<40x1xf32> to vector<40x32xf32>
    %11 = arith.mulf %3, %10 : vector<40x32xf32>
    %c0_3 = arith.constant 0 : index
    %c0_4 = arith.constant 0 : index
    %12 = vector.load %arg2[%c0_3, %c0_4] : memref<40x32xf32, #tpu.memory_space<vmem>>, vector<40x32xf32>
    %13 = arith.mulf %12, %12 : vector<40x32xf32>
    %cst_5 = arith.constant dense<0.000000e+00> : vector<40xf32>
    %14 = vector.multi_reduction <add>, %13, %cst_5 [1] : vector<40x32xf32> to vector<40xf32>
    %15 = vector.shape_cast %14 : vector<40xf32> to vector<40x1xf32>
    %cst_6 = arith.constant 1.000000e-24 : f32
    %16 = vector.broadcast %cst_6 : f32 to vector<40x1xf32>
    %17 = arith.maximumf %15, %16 : vector<40x1xf32>
    %18 = math.rsqrt %17 : vector<40x1xf32>
    %19 = vector.broadcast %18 : vector<40x1xf32> to vector<40x32xf32>
    %20 = arith.mulf %12, %19 : vector<40x32xf32>
    %c0_7 = arith.constant 0 : index
    %c0_8 = arith.constant 0 : index
    %21 = vector.load %arg3[%c0_7, %c0_8] : memref<24x32xf32, #tpu.memory_space<vmem>>, vector<24x32xf32>
    %22 = arith.mulf %21, %21 : vector<24x32xf32>
    %cst_9 = arith.constant dense<0.000000e+00> : vector<24xf32>
    %23 = vector.multi_reduction <add>, %22, %cst_9 [1] : vector<24x32xf32> to vector<24xf32>
    %24 = vector.shape_cast %23 : vector<24xf32> to vector<24x1xf32>
    %cst_10 = arith.constant 1.000000e-24 : f32
    %25 = vector.broadcast %cst_10 : f32 to vector<24x1xf32>
    %26 = arith.maximumf %24, %25 : vector<24x1xf32>
    %27 = math.rsqrt %26 : vector<24x1xf32>
    %28 = vector.broadcast %27 : vector<24x1xf32> to vector<24x32xf32>
    %29 = arith.mulf %21, %28 : vector<24x32xf32>
    %30 = arith.truncf %11 : vector<40x32xf32> to vector<40x32xbf16>
    %31 = arith.truncf %20 : vector<40x32xf32> to vector<40x32xbf16>
    %32 = arith.truncf %29 : vector<24x32xf32> to vector<24x32xbf16>
    %cst_11 = arith.constant dense<0.000000e+00> : vector<40x24xf32>
    %33 = tpu.matmul %30, %32, %cst_11 {dimension_numbers = #tpu.dot_dimension_numbers<[1], [1], [0], [0], [0, 0, 1, 0], [], []>} : vector<40x32xbf16>, vector<24x32xbf16>, vector<40x24xf32> -> vector<40x24xf32>
    %cst_12 = arith.constant 1.000000e+01 : f32
    %34 = vector.broadcast %cst_12 : f32 to vector<40x24xf32>
    %35 = arith.mulf %33, %34 : vector<40x24xf32>
    %36 = math.exp %35 : vector<40x24xf32>
    %c0_13 = arith.constant 0 : index
    %c0_14 = arith.constant 0 : index
    %37 = vector.load %arg5[%c0_13, %c0_14] : memref<1x24xf32, #tpu.memory_space<vmem>>, vector<1x24xf32>
    %cst_15 = arith.constant dense<0.000000e+00> : vector<24xf32>
    %38 = vector.multi_reduction <add>, %36, %cst_15 [0] : vector<40x24xf32> to vector<24xf32>
    %39 = vector.shape_cast %38 : vector<24xf32> to vector<1x24xf32>
    %40 = arith.addf %37, %39 : vector<1x24xf32>
    %c0_16 = arith.constant 0 : index
    %c0_17 = arith.constant 0 : index
    %41 = vector.load %arg5[%c0_16, %c0_17] : memref<1x24xf32, #tpu.memory_space<vmem>>, vector<1x24xf32>
    tpu.vector_store %arg5[%c0_16, %c0_17], %40 {strides = array<i32>} : memref<1x24xf32, #tpu.memory_space<vmem>>, vector<1x24xf32>,
    %cst_18 = arith.constant dense<0.000000e+00> : vector<40xf32>
    %42 = vector.multi_reduction <add>, %36, %cst_18 [1] : vector<40x24xf32> to vector<40xf32>
    %43 = vector.shape_cast %42 : vector<40xf32> to vector<40x1xf32>
    %cst_19 = arith.constant dense<0.000000e+00> : vector<40x40xf32>
    %44 = tpu.matmul %30, %31, %cst_19 {dimension_numbers = #tpu.dot_dimension_numbers<[1], [1], [0], [0], [0, 0, 1, 0], [], []>} : vector<40x32xbf16>, vector<40x32xbf16>, vector<40x40xf32> -> vector<40x40xf32>
    %cst_20 = arith.constant 1.000000e+01 : f32
    %45 = vector.broadcast %cst_20 : f32 to vector<40x40xf32>
    %46 = arith.mulf %44, %45 : vector<40x40xf32>
    %47 = math.exp %46 : vector<40x40xf32>
    %48 = vector.broadcast %43 : vector<40x1xf32> to vector<40x40xf32>
    %49 = arith.addf %47, %48 : vector<40x40xf32>
    %50 = math.log %49 : vector<40x40xf32>
    %51 = arith.subf %50, %46 : vector<40x40xf32>
    %cst_21 = arith.constant dense<0.000000e+00> : vector<40xf32>
    %52 = vector.multi_reduction <add>, %51, %cst_21 [1] : vector<40x40xf32> to vector<40xf32>
    %53 = vector.shape_cast %52 : vector<40xf32> to vector<40x1xf32>
    %cst_22 = arith.constant 22026.4648 : f32
    %54 = vector.broadcast %cst_22 : f32 to vector<40x1xf32>
    %55 = arith.addf %54, %43 : vector<40x1xf32>
    %56 = math.log %55 : vector<40x1xf32>
    %cst_23 = arith.constant 1.000000e+01 : f32
    %57 = vector.broadcast %cst_23 : f32 to vector<40x1xf32>
    %58 = arith.subf %56, %57 : vector<40x1xf32>
    %59 = arith.subf %53, %58 : vector<40x1xf32>
    %c0_24 = arith.constant 0 : index
    %c0_25 = arith.constant 0 : index
    %60 = vector.load %arg4[%c0_24, %c0_25] : memref<40x1xf32, #tpu.memory_space<vmem>>, vector<40x1xf32>
    tpu.vector_store %arg4[%c0_24, %c0_25], %59 {strides = array<i32>} : memref<40x1xf32, #tpu.memory_space<vmem>>, vector<40x1xf32>,
    return
  }
  func.func @transform_0(%arg0: i32) -> (i32, i32) {
    %c0_i32 = arith.constant 0 : i32
    %c0_i32_0 = arith.constant 0 : i32
    return %arg0, %c0_i32 : i32, i32
  }
  func.func @transform_1(%arg0: i32) -> (i32, i32) {
    %c0_i32 = arith.constant 0 : i32
    %c0_i32_0 = arith.constant 0 : i32
    %c0_i32_1 = arith.constant 0 : i32
    return %c0_i32, %c0_i32_0 : i32, i32
  }
  func.func @transform_2(%arg0: i32) -> (i32, i32) {
    %c0_i32 = arith.constant 0 : i32
    %c0_i32_0 = arith.constant 0 : i32
    %c0_i32_1 = arith.constant 0 : i32
    return %c0_i32, %c0_i32_0 : i32, i32
  }
  func.func @transform_3(%arg0: i32) -> (i32, i32) {
    %c0_i32 = arith.constant 0 : i32
    %c0_i32_0 = arith.constant 0 : i32
    return %arg0, %c0_i32 : i32, i32
  }
  func.func @transform_4(%arg0: i32) -> (i32, i32) {
    %c0_i32 = arith.constant 0 : i32
    %c0_i32_0 = arith.constant 0 : i32
    %c0_i32_1 = arith.constant 0 : i32
    return %c0_i32, %c0_i32_0 : i32, i32
  }
}

</mosaic_0001>

<bundles_post_ra>
// kernel: tpu_custom_call.1
= control target key start
LH: loop header
LB: loop body
LE: loop exit
PB: predicated region body
PF: predicated region fallthrough
CT: control target
= control target key end

     0   :  { %vm34_vm0 = vcmask 261120   ;;  %s1032_s0 = inlined_call_operand.vmem [shape: f32[40,32], index: 0, kind: input, shape index: {}]   ;;  %s1033_s1 = inlined_call_operand.vmem [shape: f32[40,32], index: 1, kind: input, shape index: {}]   ;;  %s1034_s2 = inlined_call_operand.vmem [shape: f32[24,32], index: 2, kind: input, shape index: {}]   ;;  %s1035_s3 = inlined_call_operand.vmem [shape: f32[40,1], index: 3, kind: output, shape index: {0}]   ;;  %s1036_s4 = inlined_call_operand.hbm [shape: f32[1,24], index: 4, kind: output, shape index: {1}]  }
   0x1   :  { %v611_v0 = vld [vmem:[%s1034_s2 + $0x10] sm:$0xff]  ;;  %v616_v1 = vld [vmem:[%s1034_s2 + $0x8] sm:$0xff]  ;;  %v621_v2 = vld [vmem:[%s1032_s0 + $0x18] sm:$0xff] }
   0x2   :  { %v200_v3 = vmul.f32 %v611_v0, %v611_v0  ;;  %v199_v4 = vmul.f32 %v616_v1, %v616_v1  ;;  %v32_v5 = vmul.f32 %v621_v2, %v621_v2  ;;  %v632_v6 = vld [vmem:[%s1034_s2] sm:$0xff]  ;;  %v637_v7 = vld [vmem:[%s1032_s0 + $0x10] sm:$0xff] }
   0x3   :  { %v645_v11 = vld [vmem:[%s1032_s0] sm:$0xff] }
   0x4   :  { %v207_v8 = vsel %vm34_vm0, %v200_v3, 0.0  ;;  %v204_v9 = vsel %vm34_vm0, %v199_v4, 0.0  ;;  %v44_v10 = vsel %vm34_vm0, %v32_v5, 0.0 }
   0x5   :  { %208 = vadd.xlane.f32.xlu0 %v207_v8  ;;  %205 = vadd.xlane.f32.xlu1 %v204_v9 }
   0x6   :  { %10 = vsyncpa [#allocation3], 0  ;;  %45 = vadd.xlane.f32.xlu2 %v44_v10  ;;  %v198_v12 = vmul.f32 %v632_v6, %v632_v6  ;;  %v31_v13 = vmul.f32 %v637_v7, %v637_v7  ;;  %v29_v14 = vmul.f32 %v645_v11, %v645_v11  ;;  %v659_v18 = vld [vmem:[%s1032_s0 + $0x20] sm:$0xff]  ;;  %v664_v19 = vld [vmem:[%s1032_s0 + $0x8] sm:$0xff]  ;;  %s460_s14 = sshll.u32 %s1036_s4, 4  ;;  %s582_s15 = smov [#allocation2]   ;;  %s461_s14 = int_to_ptr.hbm [resolvable:$true] %s460_s14 }
   0x7   :  { %v669_v20 = vld [vmem:[%s1033_s1 + $0x20] sm:$0xff]  ;;  %v33_v21 = vmul.f32 %v659_v18, %v659_v18  ;;  %v30_v22 = vmul.f32 %v664_v19, %v664_v19  ;;  %v683_v27 = vld [vmem:[%s1033_s1 + $0x18] sm:$0xff]  ;;  %v688_v28 = vld [vmem:[%s1033_s1 + $0x10] sm:$0xff]  ;;  %s458_s16 = sshll.u32 %s582_s15, 4  ;;  %s459_s16 = int_to_ptr.vmem [resolvable:$true] %s458_s16 }
   0x8   :  { %v201_v15 = vsel %vm34_vm0, %v198_v12, 0.0  ;;  %v41_v16 = vsel %vm34_vm0, %v31_v13, 0.0  ;;  %v35_v17 = vsel %vm34_vm0, %v29_v14, 0.0  ;;  %v119_v23 = vmul.f32 %v669_v20, %v669_v20  ;;  %v693_v29 = vld [vmem:[%s1033_s1] sm:$0xff]  ;;  %v706_v35 = vld [vmem:[%s1033_s1 + $0x8] sm:$0xff] }
   0x9   :  { %v47_v24 = vsel %vm34_vm0, %v33_v21, 0.0  ;;  %v38_v25 = vsel %vm34_vm0, %v30_v22, 0.0  ;;  %v118_v30 = vmul.f32 %v683_v27, %v683_v27  ;;  %v117_v31 = vmul.f32 %v688_v28, %v688_v28 }
   0xa   :  { %v132_v26 = vsel %vm34_vm0, %v119_v23, 0.0  ;;  %v115_v32 = vmul.f32 %v693_v29, %v693_v29  ;;  %v116_v37 = vmul.f32 %v706_v35, %v706_v35 }
   0xb   :  { %v129_v33 = vsel %vm34_vm0, %v118_v30, 0.0  ;;  %v126_v34 = vsel %vm34_vm0, %v117_v31, 0.0 }
   0xc   :  { %v120_v36 = vsel %vm34_vm0, %v115_v32, 0.0  ;;  %v123_v38 = vsel %vm34_vm0, %v116_v37, 0.0 }
   0xd   :  { %202 = vadd.xlane.f32.xlu0 %v201_v15  ;;  %42 = vadd.xlane.f32.xlu1 %v41_v16 }
   0xe   :  { %36 = vadd.xlane.f32.xlu2 %v35_v17 }
  0x15   :  { %48 = vadd.xlane.f32.xlu1 %v47_v24  ;;  %39 = vadd.xlane.f32.xlu0 %v38_v25 }
  0x16   :  { %133 = vadd.xlane.f32.xlu2 %v132_v26 }
  0x1d   :  { %130 = vadd.xlane.f32.xlu1 %v129_v33  ;;  %127 = vadd.xlane.f32.xlu0 %v126_v34 }
  0x1e   :  { %121 = vadd.xlane.f32.xlu2 %v120_v36 }
  0x25   :  { %124 = vadd.xlane.f32.xlu0 %v123_v38 }
  0x78   :  { %v209_v39 = vpop.xlane.xlu0 %208  ;;  %v206_v40 = vpop.xlane.xlu1 %205 }
  0x79   :  { %v212_v41 = vmax.f32 %v209_v39, 1e-24  ;;  %v712_v42 = vmax.f32 %v206_v40, 1e-24  ;;  %v46_v43 = vpop.xlane.xlu2 %45 }
  0x7a   :  { %v714_v44 = vmax.f32 %v46_v43, 1e-24 }
  0x7b   :  { %489 = vrsqrt.f32 %v212_v41  ;;  %vm239_vm1 = vweird.f32 %v212_v41  ;;  %vm229_vm3 = vweird.f32 %v712_v42 }
  0x7c   :  { %491 = vrsqrt.f32 %v712_v42  ;;  %vm91_vm4 = vweird.f32 %v714_v44 }
  0x7d   :  { %493 = vrsqrt.f32 %v714_v44 }
  0x80   :  { %v203_v45 = vpop.xlane.xlu0 %202  ;;  %v43_v46 = vpop.xlane.xlu1 %42 }
  0x81   :  { %v718_v47 = vpop.eup %489  ;;  %v720_v48 = vmax.f32 %v203_v45, 1e-24  ;;  %v722_v49 = vmax.f32 %v43_v46, 1e-24  ;;  %v37_v50 = vpop.xlane.xlu2 %36 }
  0x82   :  { %v724_v51 = vpop.eup %491  ;;  %v234_v52 = vmul.f32 %v718_v47, %v212_v41  ;;  %v727_v53 = vmax.f32 %v37_v50, 1e-24  ;;  %vm240_vm2 = vweird.f32 %v718_v47 }
  0x83   :  { %v729_v54 = vpop.eup %493  ;;  %495 = vrsqrt.f32 %v720_v48  ;;  %v224_v56 = vmul.f32 %v724_v51, %v712_v42  ;;  %vm230_vm5 = vweird.f32 %v724_v51  ;;  %vm771_vm6 = vmor %vm239_vm1, %vm240_vm2  ;;  %vm219_vm8 = vweird.f32 %v720_v48 }
  0x84   :  { %v235_v55 = vmul.f32 %v718_v47, %v234_v52  ;;  %v86_v57 = vmul.f32 %v729_v54, %v714_v44  ;;  %497 = vrsqrt.f32 %v722_v49  ;;  %vm92_vm7 = vweird.f32 %v729_v54 }
  0x85   :  { %499 = vrsqrt.f32 %v727_v53  ;;  %v225_v60 = vmul.f32 %v724_v51, %v224_v56  ;;  %vm61_vm9 = vweird.f32 %v727_v53  ;;  %vm81_vm11 = vweird.f32 %v722_v49  ;;  %vm797_vm12 = vmor %vm91_vm4, %vm92_vm7 }
  0x86   :  { %v236_v58 = vmul.f32 0.5, %v235_v55  ;;  %v87_v59 = vmul.f32 %v729_v54, %v86_v57  ;;  %vm834_vm4 = vmor %vm229_vm3, %vm230_vm5 }
  0x87   :  { %v226_v16 = vmul.f32 0.5, %v225_v60 }
  0x88   :  { %v49_v61 = vpop.xlane.xlu1 %48  ;;  %v40_v62 = vpop.xlane.xlu0 %39  ;;  %v88_v3 = vmul.f32 0.5, %v87_v59  ;;  %v237_v10 = vsub.f32 1.5, %v236_v58 }
  0x89   :  { %v741_v63 = vpop.eup %495  ;;  %v743_v4 = vmax.f32 %v49_v61, 1e-24  ;;  %v745_v5 = vmax.f32 %v40_v62, 1e-24  ;;  %v134_v8 = vpop.xlane.xlu2 %133  ;;  %v227_v32 = vsub.f32 1.5, %v226_v16 }
  0x8a   :  { %v747_v9 = vpop.eup %497  ;;  %v214_v12 = vmul.f32 %v741_v63, %v720_v48  ;;  %v751_v13 = vmax.f32 %v134_v8, 1e-24  ;;  %v89_v22 = vsub.f32 1.5, %v88_v3  ;;  %v238_v25 = vmul.f32 %v718_v47, %v237_v10 }
  0x8b   :  { %v753_v14 = vpop.eup %499  ;;  %v76_v15 = vmul.f32 %v747_v9, %v722_v49  ;;  %501 = vrsqrt.f32 %v743_v4  ;;  %vm220_vm10 = vweird.f32 %v741_v63  ;;  %vm82_vm13 = vweird.f32 %v747_v9 }
  0x8c   :  { %v215_v17 = vmul.f32 %v741_v63, %v214_v12  ;;  %v56_v21 = vmul.f32 %v753_v14, %v727_v53  ;;  %503 = vrsqrt.f32 %v745_v5  ;;  %v242_v37 = vsel %vm771_vm6, %v718_v47, %v238_v25  ;;  %vm846_vm6 = vmor %vm219_vm8, %vm220_vm10 }
  0x8d   :  { %v77_v23 = vmul.f32 %v747_v9, %v76_v15  ;;  %505 = vrsqrt.f32 %v751_v13  ;;  %v786_v39 = vmul.f32 %v729_v54, %v89_v22  ;;  %v245_v43 = vmul.f32 %v242_v37, %v611_v0 }
  0x8e   :  { %v57_v24 = vmul.f32 %v753_v14, %v56_v21  ;;  %v216_v30 = vmul.f32 0.5, %v215_v17  ;;  %vm62_vm14 = vweird.f32 %v753_v14  ;;  %vm71_vm15 = vweird.f32 %v745_v5 }
  0x8f   :  { %v78_v31 = vmul.f32 0.5, %v77_v23  ;;  %vm186_vm1 = vweird.f32 %v751_v13  ;;  %v228_v58 = vmul.f32 %v724_v51, %v227_v32  ;;  %v253_v60 = vpack.c.bf16 %v245_v43, %v245_v43  ;;  %vm861_vm5 = vmor %vm61_vm9, %vm62_vm14 }
  0x90   :  { %v58_v33 = vmul.f32 0.5, %v57_v24  ;;  %v131_v34 = vpop.xlane.xlu1 %130  ;;  %v128_v36 = vpop.xlane.xlu0 %127  ;;  %v217_v55 = vsub.f32 1.5, %v216_v30  ;;  %v94_v61 = vsel %vm797_vm12, %v729_v54, %v786_v39  ;;  %vm881_vm9 = vmor %vm81_vm11, %vm82_vm13 }
  0x91   :  { %v783_v38 = vpop.eup %501  ;;  %v788_v40 = vmax.f32 %v131_v34, 1e-24  ;;  %v790_v41 = vmax.f32 %v128_v36, 1e-24  ;;  %v122_v45 = vpop.xlane.xlu2 %121  ;;  %v79_v47 = vsub.f32 1.5, %v78_v31  ;;  %v267_v15 = vsel %vm34_vm0, %v253_v60, 0 }
  0x92   :  { %v803_v50 = vmax.f32 %v122_v45, 1e-24  ;;  %v805_v52 = vpop.eup %503  ;;  %v96_v0 = vmul.f32 %v783_v38, %v743_v4  ;;  %v59_v56 = vsub.f32 1.5, %v58_v33  ;;  %v218_v16 = vmul.f32 %v741_v63, %v217_v55  ;;  %275 = vmatpush.bf16.xpose.msra.mxu0 %v267_v15  ;;  %482 = vmatpush.bf16.xpose.msra.mxu3 %v267_v15 }
  0x93   :  { %507 = vrsqrt.f32 %v788_v40  ;;  %v811_v44 = vpop.eup %505  ;;  %v66_v57 = vmul.f32 %v805_v52, %v745_v5  ;;  %v825_v62 = vmul.f32 %v747_v9, %v79_v47  ;;  %vm176_vm2 = vweird.f32 %v788_v40 }
  0x94   :  { %v181_v59 = vmul.f32 %v811_v44, %v751_v13  ;;  %509 = vrsqrt.f32 %v790_v41  ;;  %v97_v10 = vmul.f32 %v783_v38, %v96_v0  ;;  %v60_v42 = vmul.f32 %v753_v14, %v59_v56 }
  0x95   :  { %v67_v3 = vmul.f32 %v805_v52, %v66_v57  ;;  %511 = vrsqrt.f32 %v803_v50  ;;  %vm166_vm3 = vweird.f32 %v790_v41  ;;  %v232_v23 = vsel %vm834_vm4, %v724_v51, %v228_v58 }
  0x96   :  { %v182_v12 = vmul.f32 %v811_v44, %v181_v59  ;;  %vm72_vm7 = vweird.f32 %v805_v52  ;;  %v222_v30 = vsel %vm846_vm6, %v741_v63, %v218_v16  ;;  %vm187_vm8 = vweird.f32 %v811_v44 }
  0x97   :  { %v68_v21 = vmul.f32 0.5, %v67_v3  ;;  %v243_v53 = vmul.f32 %v222_v30, %v632_v6  ;;  %v885_v34 = vmul.f32 0.5, %v97_v10  ;;  %v244_v36 = vmul.f32 %v232_v23, %v616_v1  ;;  %vm896_vm10 = vmor %vm71_vm15, %vm72_vm7 }
  0x98   :  { %v125_v22 = vpop.xlane.xlu0 %124  ;;  %v183_v25 = vmul.f32 0.5, %v182_v12  ;;  %v64_v1 = vsel %vm861_vm5, %v753_v14, %v60_v42  ;;  %vm910_vm11 = vmor %vm186_vm1, %vm187_vm8  ;;  %v84_v0 = vsel %vm881_vm9, %v747_v9, %v825_v62  ;;  %vm146_vm14 = vweird.f32 %v803_v50 }
  0x99   :  { %v855_v24 = vpop.eup %507  ;;  %v866_v26 = vmax.f32 %v125_v22, 1e-24  ;;  %v69_v51 = vsub.f32 1.5, %v68_v21  ;;  %v252_v55 = vpack.c.bf16 %v244_v36, %v243_v53  ;;  %v105_v10 = vmul.f32 %v64_v1, %v645_v11 }
  0x9a   :  { %v171_v31 = vmul.f32 %v855_v24, %v788_v40  ;;  %v875_v32 = vpop.eup %509  ;;  %v184_v63 = vsub.f32 1.5, %v183_v25  ;;  %vm177_vm13 = vweird.f32 %v855_v24  ;;  %v107_v12 = vmul.f32 %v84_v0, %v637_v7 }
  0x9b   :  { %513 = vrsqrt.f32 %v866_v26  ;;  %v889_v37 = vpop.eup %511  ;;  %v70_v6 = vmul.f32 %v805_v52, %v69_v51  ;;  %v161_v45 = vmul.f32 %v875_v32, %v790_v41  ;;  %v264_v59 = vsel %vm34_vm0, %v252_v55, 0  ;;  %vm938_vm1 = vmor %vm176_vm2, %vm177_vm13 }
  0x9c   :  { %v172_v43 = vmul.f32 %v855_v24, %v171_v31  ;;  %v141_v5 = vmul.f32 %v889_v37, %v803_v50  ;;  %v185_v57 = vmul.f32 %v811_v44, %v184_v63  ;;  %vm167_vm15 = vweird.f32 %v875_v32  ;;  %276 = vmatpush.bf16.xpose.msra.mxu0 %v264_v59  ;;  %483 = vmatpush.bf16.xpose.msra.mxu3 %v264_v59 }
  0x9d   :  { %v162_v56 = vmul.f32 %v875_v32, %v161_v45  ;;  %v74_v13 = vsel %vm896_vm10, %v805_v52, %v70_v6  ;;  %vm147_vm4 = vweird.f32 %v889_v37  ;;  %vm950_vm2 = vmor %vm166_vm3, %vm167_vm15  ;;  %v108_v7 = vmul.f32 %v94_v61, %v621_v2 }
  0x9e   :  { %v173_v14 = vmul.f32 0.5, %v172_v43  ;;  %v142_v58 = vmul.f32 %v889_v37, %v141_v5  ;;  %v106_v60 = vmul.f32 %v74_v13, %v664_v19  ;;  %v189_v9 = vsel %vm910_vm11, %v811_v44, %v185_v57  ;;  %vm967_vm6 = vmor %vm146_vm14, %vm147_vm4 }
  0x9f   :  { %v163_v8 = vmul.f32 0.5, %v162_v56  ;;  %v194_v15 = vmul.f32 %v189_v9, %v669_v20  ;;  %v99_v20 = vsub.f32 1.5, %v885_v34  ;;  %v247_v46 = vpack.c.bf16 %v108_v7, %v107_v12 }
  0xa0   :  { %v174_v3 = vsub.f32 1.5, %v173_v14  ;;  %v143_v19 = vmul.f32 0.5, %v142_v58  ;;  %v246_v21 = vpack.c.bf16 %v106_v60, %v105_v10  ;;  %vm156_vm12 = vweird.f32 %v866_v26 }
  0xa1   :  { %v514_v52 = vpop.eup %513  ;;  %v164_v16 = vsub.f32 1.5, %v163_v8  ;;  %v251_v11 = vpack.c.bf16 %v194_v15, %v194_v15  ;;  %vm101_vm5 = vweird.f32 %v743_v4  ;;  %vm102_vm7 = vweird.f32 %v783_v38 }
  0xa2   :  { %v151_v17 = vmul.f32 %v514_v52, %v866_v26  ;;  %v175_v44 = vmul.f32 %v855_v24, %v174_v3  ;;  %v144_v42 = vsub.f32 1.5, %v143_v19  ;;  %vm157_vm3 = vweird.f32 %v514_v52  ;;  %vm103_vm9 = vmor %vm101_vm5, %vm102_vm7 }
  0xa3   :  { %v165_v23 = vmul.f32 %v875_v32, %v164_v16  ;;  %v344_v54 = vsel %vm34_vm0, %v251_v11, 0  ;;  %471 = vmatmul.msk.bf16.vlgmr.msra.gmra.mxu0 %vm34_vm0, %v246_v21  ;;  %472 = vmatmul.msk.bf16.vlgmr.msra.gmra.mxu3 %vm34_vm0, %v247_v46  ;;  %vm158_vm8 = vmor %vm156_vm12, %vm157_vm3  ;;  %v100_v30 = vmul.f32 %v783_v38, %v99_v20  ;;  %vm308_vm10 = vcmask 195584  }
  0xa4   :  { %v152_v22 = vmul.f32 %v514_v52, %v151_v17  ;;  %v179_v41 = vsel %vm938_vm1, %v855_v24, %v175_v44  ;;  %v145_v39 = vmul.f32 %v889_v37, %v144_v42  ;;  %351 = vmatpush.bf16.xpose.msra.mxu1 %v344_v54  ;;  %484 = vmatpush.bf16.xpose.msra.mxu2 %v344_v54  ;;  %vm22_vm11 = vcmask 188416  }
  0xa5   :  { %v193_v2 = vmul.f32 %v179_v41, %v683_v27  ;;  %v169_v50 = vsel %vm950_vm2, %v875_v32, %v165_v23  ;;  %v104_v32 = vsel %vm103_vm9, %v783_v38, %v100_v30  ;;  %v581_v55 = vmov 0.0  }
  0xa6   :  { %v153_v61 = vmul.f32 0.5, %v152_v22  ;;  %v192_v24 = vmul.f32 %v169_v50, %v688_v28  ;;  %v149_v25 = vsel %vm967_vm6, %v889_v37, %v145_v39  ;;  %v109_v34 = vmul.f32 %v104_v32, %v659_v18  ;;  %23 = vst.msk [vmem:[#allocation2] sm:$0x1] %vm22_vm11, %v581_v55 }
  0xa7   :  { %v190_v53 = vmul.f32 %v149_v25, %v693_v29  ;;  %vm445_vm13 = vcmask 7168  }
  0xa8   :  { %v154_v27 = vsub.f32 1.5, %v153_v61  ;;  %v250_v26 = vpack.c.bf16 %v193_v2, %v192_v24  ;;  %v248_v36 = vpack.c.bf16 %v109_v34, %v109_v34 }
  0xaa   :  { %v155_v51 = vmul.f32 %v514_v52, %v154_v27  ;;  %v341_v31 = vsel %vm34_vm0, %v250_v26, 0 }
  0xac   :  { %v159_v28 = vsel %vm158_vm8, %v514_v52, %v155_v51  ;;  %352 = vmatpush.bf16.xpose.msra.mxu1 %v341_v31  ;;  %485 = vmatpush.bf16.xpose.msra.mxu2 %v341_v31 }
  0xad   :  { %v191_v4 = vmul.f32 %v159_v28, %v706_v35  ;;  %v307_v22 = vld [vmem:[#allocation2] sm:$0x1] }
  0xaf   :  { %v249_v33 = vpack.c.bf16 %v191_v4, %v190_v53 }
  0xb1   :  { %v338_v63 = vsel %vm34_vm0, %v249_v33, 0 }
  0xb3   :  { %473 = vmatmul.msk.bf16.gmra.mxu3 %vm34_vm0, %v248_v36 }
  0xb4   :  { %353 = vmatpush.bf16.xpose.msra.mxu1 %v338_v63  ;;  %486 = vmatpush.bf16.xpose.msra.mxu2 %v338_v63 }
  0xbb   :  { %474 = vmatmul.msk.bf16.vlgmr.msra.gmra.mxu1 %vm34_vm0, %v246_v21  ;;  %475 = vmatmul.msk.bf16.vlgmr.msra.gmra.mxu2 %vm34_vm0, %v247_v46 }
  0xcb   :  { %476 = vmatmul.msk.bf16.gmra.mxu2 %vm34_vm0, %v248_v36  ;;  %vm404_vm0 = vcmask 326656  }
 0x120   :  { %v278_v29 = vpop.f32.mrf.mxu0 }
 0x121   :  { %v292_v35 = vmul.f32 10.0, %v278_v29 }
 0x123   :  { %v297_v37 = vmul.f32 1.442695, %v292_v35 }
 0x125   :  { %515 = vpow2.f32 %v297_v37 }
 0x126   :  { %v283_v38 = vpop.f32.mrf.mxu3 }
 0x127   :  { %v294_v6 = vmul.f32 10.0, %v283_v38 }
 0x128   :  { %v280_v18 = vpop.f32.mrf.mxu0 }
 0x129   :  { %v301_v49 = vmul.f32 1.442695, %v294_v6  ;;  %v293_v43 = vmul.f32 10.0, %v280_v18 }
 0x12b   :  { %v516_v45 = vpop.eup %515  ;;  %517 = vpow2.f32 %v301_v49  ;;  %v299_v1 = vmul.f32 1.442695, %v293_v43 }
 0x12c   :  { %v309_v47 = vsel %vm308_vm10, %v516_v45, 0.0 }
 0x12d   :  { %519 = vpow2.f32 %v299_v1  ;;  %327 = vadd.xlane.f32.xlu1 %v309_v47 }
 0x12e   :  { %v285_v5 = vpop.f32.mrf.mxu3 }
 0x12f   :  { %v295_v0 = vmul.f32 10.0, %v285_v5 }
 0x131   :  { %v518_v14 = vpop.eup %517  ;;  %v303_v56 = vmul.f32 1.442695, %v295_v0 }
 0x132   :  { %v312_v13 = vsel %vm308_vm10, %v518_v14, 0.0 }
 0x133   :  { %v520_v57 = vpop.eup %519  ;;  %521 = vpow2.f32 %v303_v56  ;;  %331 = vadd.xlane.f32.xlu0 %v312_v13 }
 0x134   :  { %v310_v58 = vsel %vm308_vm10, %v520_v57, 0.0 }
 0x135   :  { %329 = vadd.xlane.f32.xlu2 %v310_v58  ;;  %v311_v52 = vadd.f32 %v310_v58, %v309_v47 }
 0x136   :  { %v288_v59 = vpop.f32.mrf.mxu3 }
 0x137   :  { %v296_v60 = vmul.f32 10.0, %v288_v59  ;;  %v313_v10 = vadd.f32 %v312_v13, %v311_v52 }
 0x138   :  { %v355_v46 = vpop.f32.mrf.mxu1 }
 0x139   :  { %v522_v3 = vpop.eup %521  ;;  %v305_v8 = vmul.f32 1.442695, %v296_v60  ;;  %v369_v54 = vmul.f32 10.0, %v355_v46 }
 0x13a   :  { %v314_v9 = vsel %vm308_vm10, %v522_v3, 0.0 }
 0x13b   :  { %523 = vpow2.f32 %v305_v8  ;;  %333 = vadd.xlane.f32.xlu1 %v314_v9  ;;  %v315_v15 = vadd.f32 %v314_v9, %v313_v10  ;;  %v374_v2 = vmul.f32 1.442695, %v369_v54 }
 0x13d   :  { %525 = vpow2.f32 %v374_v2 }
 0x13e   :  { %v360_v62 = vpop.f32.mrf.mxu2  ;;  %v290_v19 = vpop.f32.mrf.mxu3 }
 0x13f   :  { %v371_v61 = vmul.f32 10.0, %v360_v62 }
 0x140   :  { %v357_v39 = vpop.f32.mrf.mxu1 }
 0x141   :  { %v524_v12 = vpop.eup %523  ;;  %v370_v50 = vmul.f32 10.0, %v357_v39  ;;  %v378_v24 = vmul.f32 1.442695, %v371_v61 }
 0x142   :  { %v316_v16 = vsel %vm308_vm10, %v524_v12, 0.0 }
 0x143   :  { %335 = vadd.xlane.f32.xlu2 %v316_v16  ;;  %v317_v17 = vadd.f32 %v316_v16, %v315_v15  ;;  %v376_v27 = vmul.f32 1.442695, %v370_v50  ;;  %v526_v25 = vpop.eup %525  ;;  %527 = vpow2.f32 %v378_v24 }
 0x145   :  { %v318_v40 = vrot.slane %v317_v17, 4  ;;  %529 = vpow2.f32 %v376_v27 }
 0x146   :  { %v362_v44 = vpop.f32.mrf.mxu2 }
 0x147   :  { %v319_v42 = vadd.f32 %v318_v40, %v317_v17  ;;  %v372_v26 = vmul.f32 10.0, %v362_v44 }
 0x149   :  { %v320_v21 = vrot.slane %v319_v42, 2  ;;  %v380_v31 = vmul.f32 1.442695, %v372_v26  ;;  %v528_v53 = vpop.eup %527 }
 0x14b   :  { %v321_v7 = vadd.f32 %v320_v21, %v319_v42  ;;  %v530_v32 = vpop.eup %529 }
 0x14d   :  { %v322_v20 = vrot.slane %v321_v7, 1 }
 0x14e   :  { %v365_v11 = vpop.f32.mrf.mxu2 }
 0x14f   :  { %v323_v23 = vadd.f32 %v322_v20, %v321_v7  ;;  %v373_v33 = vmul.f32 10.0, %v365_v11 }
 0x151   :  { %v324_v41 = vadd.f32 %v323_v23, %v307_v22  ;;  %v382_v35 = vmul.f32 1.442695, %v373_v33 }
 0x153   :  { %326 = vst.msk [vmem:[#allocation2] sm:$0x1] %vm22_vm11, %v324_v41 }
 0x154   :  { %463 = dma.vmem_to_hbm [thread:$0]  %s459_s16, 16, %s461_s14, [#allocation3]  }
 0x156   :  { %v367_v48 = vpop.f32.mrf.mxu2 }
 0x1a0   :  { %v328_v30 = vpop.xlane.xlu1 %327 }
 0x1a1   :  { %v384_v51 = vadd.f32 %v526_v25, %v328_v30  ;;  %v420_v19 = vadd.f32 22026.465, %v328_v30 }
 0x1a3   :  { %531 = vlog2.f32 %v384_v51 }
 0x1a4   :  { %533 = vpow2.f32 %v380_v31 }
 0x1a6   :  { %v332_v28 = vpop.xlane.xlu0 %331 }
 0x1a7   :  { %v386_v4 = vadd.f32 %v528_v53, %v332_v28  ;;  %v422_v10 = vadd.f32 22026.465, %v332_v28 }
 0x1a8   :  { %v330_v34 = vpop.xlane.xlu2 %329 }
 0x1a9   :  { %v532_v63 = vpop.eup %531  ;;  %535 = vlog2.f32 %v386_v4  ;;  %v385_v36 = vadd.f32 %v530_v32, %v330_v34  ;;  %v421_v12 = vadd.f32 22026.465, %v330_v34 }
 0x1aa   :  { %v390_v29 = vmul.f32 0.6931472, %v532_v63  ;;  %v534_v38 = vpop.eup %533 }
 0x1ab   :  { %537 = vlog2.f32 %v385_v36 }
 0x1ac   :  { %v399_v37 = vsub.f32 %v390_v29, %v369_v54  ;;  %539 = vpow2.f32 %v382_v35 }
 0x1ae   :  { %v334_v6 = vpop.xlane.xlu1 %333  ;;  %v405_v18 = vsel %vm404_vm0, %v399_v37, 0.0 }
 0x1af   :  { %v536_v49 = vpop.eup %535  ;;  %v387_v43 = vadd.f32 %v534_v38, %v334_v6  ;;  %406 = vadd.xlane.f32.xlu0 %v405_v18  ;;  %v423_v17 = vadd.f32 22026.465, %v334_v6 }
 0x1b0   :  { %v394_v45 = vmul.f32 0.6931472, %v536_v49 }
 0x1b1   :  { %v538_v1 = vpop.eup %537  ;;  %541 = vlog2.f32 %v387_v43 }
 0x1b2   :  { %v392_v47 = vmul.f32 0.6931472, %v538_v1  ;;  %v401_v5 = vsub.f32 %v394_v45, %v371_v61  ;;  %v540_v14 = vpop.eup %539 }
 0x1b4   :  { %v411_v55 = vsel %vm404_vm0, %v401_v5, 0.0  ;;  %v400_v0 = vsub.f32 %v392_v47, %v370_v50 }
 0x1b5   :  { %412 = vadd.xlane.f32.xlu2 %v411_v55 }
 0x1b6   :  { %v336_v56 = vpop.xlane.xlu2 %335  ;;  %v408_v13 = vsel %vm404_vm0, %v400_v0, 0.0 }
 0x1b7   :  { %v542_v57 = vpop.eup %541  ;;  %v388_v58 = vadd.f32 %v540_v14, %v336_v56  ;;  %409 = vadd.xlane.f32.xlu1 %v408_v13  ;;  %v424_v22 = vadd.f32 22026.465, %v336_v56 }
 0x1b8   :  { %v396_v59 = vmul.f32 0.6931472, %v542_v57 }
 0x1b9   :  { %543 = vlog2.f32 %v388_v58 }
 0x1ba   :  { %v402_v60 = vsub.f32 %v396_v59, %v372_v26  ;;  %545 = vlog2.f32 %v420_v19 }
 0x1bb   :  { %547 = vlog2.f32 %v422_v10 }
 0x1bc   :  { %v414_v3 = vsel %vm404_vm0, %v402_v60, 0.0  ;;  %549 = vlog2.f32 %v421_v12 }
 0x1bd   :  { %415 = vadd.xlane.f32.xlu0 %v414_v3  ;;  %551 = vlog2.f32 %v423_v17 }
 0x1be   :  { %553 = vlog2.f32 %v424_v22 }
 0x1bf   :  { %v544_v8 = vpop.eup %543 }
 0x1c0   :  { %v398_v9 = vmul.f32 0.6931472, %v544_v8  ;;  %v546_v15 = vpop.eup %545 }
 0x1c1   :  { %v426_v16 = vmul.f32 0.6931472, %v546_v15  ;;  %v548_v44 = vpop.eup %547 }
 0x1c2   :  { %v403_v52 = vsub.f32 %v398_v9, %v373_v33  ;;  %v550_v42 = vpop.eup %549  ;;  %v430_v11 = vmul.f32 0.6931472, %v548_v44 }
 0x1c3   :  { %v477_v40 = vadd.f32 -10.0, %v426_v16  ;;  %v428_v20 = vmul.f32 0.6931472, %v550_v42  ;;  %v552_v41 = vpop.eup %551 }
 0x1c4   :  { %v417_v62 = vsel %vm404_vm0, %v403_v52, 0.0  ;;  %v479_v23 = vadd.f32 -10.0, %v430_v11  ;;  %v432_v61 = vmul.f32 0.6931472, %v552_v41  ;;  %v554_v24 = vpop.eup %553 }
 0x1c5   :  { %418 = vadd.xlane.f32.xlu1 %v417_v62  ;;  %v478_v54 = vadd.f32 -10.0, %v428_v20  ;;  %v434_v26 = vmul.f32 0.6931472, %v554_v24 }
 0x1c6   :  { %v480_v50 = vadd.f32 -10.0, %v432_v61 }
 0x1c7   :  { %v481_v30 = vadd.f32 -10.0, %v434_v26 }
 0x222   :  { %v407_v21 = vpop.xlane.xlu0 %406 }
 0x223   :  { %v440_v7 = vsub.f32 %v407_v21, %v477_v40 }
 0x225   :  { %446 = vst.msk [vmem:[%s1035_s3] sm:$0xff] %vm445_vm13, %v440_v7 }
 0x228   :  { %v413_v48 = vpop.xlane.xlu2 %412 }
 0x229   :  { %v442_v46 = vsub.f32 %v413_v48, %v479_v23 }
 0x22a   :  { %v410_v2 = vpop.xlane.xlu1 %409 }
 0x22b   :  { %448 = vst.msk [vmem:[%s1035_s3 + $0x10] sm:$0xff] %vm445_vm13, %v442_v46  ;;  %v441_v39 = vsub.f32 %v410_v2, %v478_v54 }
 0x22d   :  { %447 = vst.msk [vmem:[%s1035_s3 + $0x8] sm:$0xff] %vm445_vm13, %v441_v39 }
 0x230   :  { %v416_v27 = vpop.xlane.xlu0 %415 }
 0x231   :  { %v443_v25 = vsub.f32 %v416_v27, %v480_v50 }
 0x233   :  { %449 = vst.msk [vmem:[%s1035_s3 + $0x18] sm:$0xff] %vm445_vm13, %v443_v25 }
 0x238   :  { %v419_v51 = vpop.xlane.xlu1 %418 }
 0x239   :  { %v444_v31 = vsub.f32 %v419_v51, %v481_v30 }
 0x23b   :  { %450 = vst.msk [vmem:[%s1035_s3 + $0x20] sm:$0xff] %vm445_vm13, %v444_v31 }
 0x23c   :  { %579 = dma.done.wait [#allocation3], 16  }
 0x23d   :  { %580 = vsyncadd [#allocation3], 4294967280 }
 0x23e   :  { %470 = vsyncpa [#allocation3], 1 }

</bundles_post_ra>
